<compile_context>
chip_gen: v7x
topology: tpu7x:2x2x1
jax: 0.10.0
libtpu: 0.0.40
codegen_flags: <defaults>
</compile_context>

<pallas_src>
import jax
import jax.numpy as jnp
from jax.experimental import pallas as pl
from jax.experimental.pallas import tpu as pltpu


def _attn_kernel(g_ref, x_ref, wg_ref, wx_ref, b_ref, wpsi_ref, bpsi_ref, out_ref):
    g = g_ref[...]                                 # (F_g, TM), input dtype (f32/bf16)
    x = x_ref[...]                                 # (F_l, TM), input dtype (f32/bf16)

    # Two 1x1 convs on the MXU (channels on sublanes, spatial rows on lanes),
    # operands in the I/O dtype, f32 accumulation, pre-summed bias column.
    # Kept as two dots (not a sublane-concat single matmul): the extra vmatmul
    # is hidden on this HBM-bound kernel and avoids an unaligned relayout.
    p = (jnp.dot(wg_ref[...], g, preferred_element_type=jnp.float32)
         + jnp.dot(wx_ref[...], x, preferred_element_type=jnp.float32)
         + b_ref[...])                             # (F_int, TM) f32
    p = jnp.maximum(p, 0.0)                        # relu

    # psi: BN-folded width-1 conv as broadcast-mul + sublane reduce (XLU);
    # folded bias comes from SMEM as a scalar.  All f32.
    s = jnp.sum(p * wpsi_ref[...], axis=0, keepdims=True) + bpsi_ref[0]   # (1, TM)
    s = jax.nn.sigmoid(s)

    # Gate x by psi (broadcast over channel sublanes).  Multiply happens in
    # f32 (x widened per-op, no materialized f32 copy); cast only at the store.
    out_ref[...] = (x * s).astype(out_ref.dtype)


def basic_attention(g, x, params, *, tile_m=2048, eps=1e-5):
    """g: (N, F_g, H, W), x: (N, F_l, H, W)  ->  (N, F_l, H, W) in x.dtype."""
    N, F_g, H, W = g.shape
    _, F_l, _, _ = x.shape
    F_int = params["wg"].shape[0]
    HW = H * W

    act_dtype = x.dtype
    itemsize = jnp.dtype(act_dtype).itemsize

    # ---- tile sizing ---------------------------------------------------
    HW_r = ((HW + 127) // 128) * 128                       # 128-rounded row count
    tile_m = max(128, (tile_m // 128) * 128)
    tile_m = min(tile_m, HW_r)

    # Generation-aware VMEM budget: double-buffered in/out activation tiles +
    # the f32 (F_int, tile_m) intermediate must fit with headroom.
    try:
        vmem_cap = int(pltpu.get_tpu_info().vmem_capacity_bytes)   # 64 MiB v7x, 128 MiB v5e/v6e
    except Exception:
        vmem_cap = 64 * 1024 * 1024                                # v7x-safe fallback
    budget = int(vmem_cap * 0.6)
    per_col = 2 * (F_g + 2 * F_l) * itemsize + F_int * 4           # bytes per spatial column
    fit = max(128, (budget // per_col // 128) * 128)
    tile_m = min(tile_m, fit)

    # Make sure the grid has >= ~4 steps so both v7x TensorCores are used and
    # the BlockSpec double-buffering actually overlaps DMA with compute.
    min_steps = 4
    if N * pl.cdiv(HW, tile_m) < min_steps:
        want_tiles = -(-min_steps // N)                            # tiles per batch
        cap = max(128, ((-(-HW // want_tiles)) + 127) // 128 * 128)
        tile_m = min(tile_m, cap)

    num_tiles = pl.cdiv(HW, tile_m)                                # ragged tail handled by Mosaic masking

    # ---- weight / BN folding (all tiny, stays f32) ----------------------
    bn_scale = params["bn_gamma"] / jnp.sqrt(params["bn_var"] + eps)       # (F_int,)
    bn_shift = params["bn_beta"] - params["bn_mean"] * bn_scale            # (F_int,)
    wpsi = params["wpsi"].reshape(F_int)
    wpsi_eff = (wpsi * bn_scale).reshape(F_int, 1).astype(jnp.float32)
    bpsi_eff = (jnp.dot(bn_shift, wpsi) + params["bpsi"].reshape(())
                ).reshape(1).astype(jnp.float32)
    b_cat = (params["bg"] + params["bx"]).reshape(F_int, 1).astype(jnp.float32)

    # MXU operands in the I/O dtype (bf16-native on all gens, f32 accumulation).
    wg = params["wg"].astype(act_dtype)
    wx = params["wx"].astype(act_dtype)

    # NCHW -> (N, C, H*W) is a free reshape (no transpose, no pad).
    g3 = g.reshape(N, F_g, HW).astype(act_dtype)
    x3 = x.reshape(N, F_l, HW)

    row_map = lambda n, i: (n, 0, i)
    const_map = lambda n, i: (0, 0)

    rows = N * HW
    cost = pl.CostEstimate(
        flops=rows * (2 * (F_g + F_l) * F_int + 4 * F_int + F_l + 2),
        transcendentals=rows,
        bytes_accessed=rows * (F_g + 2 * F_l) * itemsize
                       + (F_int * (F_g + F_l) ) * itemsize
                       + (F_int * 2 + 1) * 4,
    )

    vmem_limit = min(int(vmem_cap * 0.75), 100 * 1024 * 1024)

    out = pl.pallas_call(
        _attn_kernel,
        out_shape=jax.ShapeDtypeStruct((N, F_l, HW), x.dtype),
        grid=(N, num_tiles),
        in_specs=[
            pl.BlockSpec((None, F_g, tile_m), row_map),                 # g rows
            pl.BlockSpec((None, F_l, tile_m), row_map),                 # x rows
            pl.BlockSpec((F_int, F_g), const_map),                      # W_g
            pl.BlockSpec((F_int, F_l), const_map),                      # W_x
            pl.BlockSpec((F_int, 1), const_map),                        # b_g + b_x (f32)
            pl.BlockSpec((F_int, 1), const_map),                        # BN-folded W_psi (f32)
            pl.BlockSpec(memory_space=pltpu.MemorySpace.SMEM),          # folded psi bias (f32)
        ],
        out_specs=pl.BlockSpec((None, F_l, tile_m), row_map),
        compiler_params=pltpu.CompilerParams(
            dimension_semantics=("parallel", "parallel"),
            vmem_limit_bytes=vmem_limit),
        cost_estimate=cost,
    )(g3, x3, wg, wx, b_cat, wpsi_eff, bpsi_eff)

    return out.reshape(N, F_l, H, W)               # free reshape, no slice/pad


def init_params(key, F_g, F_l, F_int):
    ks = jax.random.split(key, 10)
    s = 0.1
    return {
        # 1x1 conv weights stored as (C_out, C_in) for the (C, rows) layout
        "wg": s * jax.random.normal(ks[0], (F_int, F_g), jnp.float32),
        "bg": s * jax.random.normal(ks[1], (F_int,), jnp.float32),
        "wx": s * jax.random.normal(ks[2], (F_int, F_l), jnp.float32),
        "bx": s * jax.random.normal(ks[3], (F_int,), jnp.float32),
        "bn_gamma": 1.0 + s * jax.random.normal(ks[4], (F_int,), jnp.float32),
        "bn_beta": s * jax.random.normal(ks[5], (F_int,), jnp.float32),
        "bn_mean": s * jax.random.normal(ks[6], (F_int,), jnp.float32),
        "bn_var": 0.5 + jnp.abs(jax.random.normal(ks[7], (F_int,), jnp.float32)),
        "wpsi": s * jax.random.normal(ks[8], (F_int,), jnp.float32),
        "bpsi": s * jax.random.normal(ks[9], (1,), jnp.float32),
    }


def reference(g, x, params, eps=1e-5):
    """Pure-JAX reference (eval-mode BN), NCHW in / NCHW out, f32 math."""
    g1 = jnp.einsum("oc,nchw->nohw", params["wg"], g) + params["bg"][None, :, None, None]
    x1 = jnp.einsum("oc,nchw->nohw", params["wx"], x) + params["bx"][None, :, None, None]
    p = jnp.maximum(g1 + x1, 0.0)
    scale = params["bn_gamma"] / jnp.sqrt(params["bn_var"] + eps)
    p = (p - params["bn_mean"][None, :, None, None]) * scale[None, :, None, None] \
        + params["bn_beta"][None, :, None, None]
    s = jnp.einsum("c,nchw->nhw", params["wpsi"], p)[:, None] + params["bpsi"].reshape(())
    s = jax.nn.sigmoid(s)
    return x * s


if __name__ == "__main__":
    N, F_g, F_l, F_int, Hh, Ww = 2, 4, 4, 8, 16, 16
    key = jax.random.PRNGKey(0)
    kg, kx, kp = jax.random.split(key, 3)

    g = jax.random.normal(kg, (N, F_g, Hh, Ww), jnp.float32)
    x = jax.random.normal(kx, (N, F_l, Hh, Ww), jnp.float32)
    params = init_params(kp, F_g, F_l, F_int)

    fn = jax.jit(basic_attention)

    # f32 I/O path: strict check against the pure-JAX reference.
    out_f32 = jax.block_until_ready(fn(g, x, params))
    ref = reference(g, x, params)
    assert out_f32.shape == (N, F_l, Hh, Ww)
    assert out_f32.dtype == jnp.float32
    assert jnp.allclose(out_f32, ref, atol=1e-4, rtol=1e-4), \
        float(jnp.max(jnp.abs(out_f32 - ref)))

    # bf16 I/O path (halves HBM traffic on the memory-bound kernel): compare
    # against the f32 reference evaluated on the same bf16-rounded inputs.
    g16, x16 = g.astype(jnp.bfloat16), x.astype(jnp.bfloat16)
    out_b16 = jax.block_until_ready(fn(g16, x16, params))
    ref16 = reference(g16.astype(jnp.float32), x16.astype(jnp.float32), params)
    assert out_b16.dtype == jnp.bfloat16
    assert jnp.allclose(out_b16.astype(jnp.float32), ref16, atol=5e-2, rtol=5e-2), \
        float(jnp.max(jnp.abs(out_b16.astype(jnp.float32) - ref16)))

    print("KERNEL_OK")
</pallas_src>

<mosaic_0001>
module attributes {stable_mosaic.version = 11 : i64} {
  func.func @_attn_kernel(%arg0: i32, %arg1: i32, %arg2: memref<1x4x128xf32, #tpu.memory_space<vmem>>, %arg3: memref<1x4x128xf32, #tpu.memory_space<vmem>>, %arg4: memref<8x4xf32, #tpu.memory_space<vmem>>, %arg5: memref<8x4xf32, #tpu.memory_space<vmem>>, %arg6: memref<8x1xf32, #tpu.memory_space<vmem>>, %arg7: memref<8x1xf32, #tpu.memory_space<vmem>>, %arg8: memref<1xf32, #tpu.memory_space<smem>>, %arg9: memref<1x4x128xf32, #tpu.memory_space<vmem>>) attributes {dimension_semantics = [#tpu.dimension_semantics<parallel>, #tpu.dimension_semantics<parallel>], iteration_bounds = array<i64: 2, 2>, scalar_prefetch = 0 : i64, scratch_operands = 0 : i64, tpu.core_type = #tpu.core_type<tc>, window_params = [{transform_indices = @transform_0, window_bounds = array<i64: 1, 4, 128>}, {transform_indices = @transform_1, window_bounds = array<i64: 1, 4, 128>}, {pipeline_mode = #tpu.pipeline_mode<synchronous>, transform_indices = @transform_2, window_bounds = array<i64: 8, 4>}, {pipeline_mode = #tpu.pipeline_mode<synchronous>, transform_indices = @transform_3, window_bounds = array<i64: 8, 4>}, {pipeline_mode = #tpu.pipeline_mode<synchronous>, transform_indices = @transform_4, window_bounds = array<i64: 8, 1>}, {pipeline_mode = #tpu.pipeline_mode<synchronous>, transform_indices = @transform_5, window_bounds = array<i64: 8, 1>}, {transform_indices = @transform_6, window_bounds = array<i64: 1>}, {transform_indices = @transform_7, window_bounds = array<i64: 1, 4, 128>}]} {
    %c0 = arith.constant 0 : index
    %c0_0 = arith.constant 0 : index
    %c0_1 = arith.constant 0 : index
    %0 = vector.load %arg2[%c0, %c0_0, %c0_1] : memref<1x4x128xf32, #tpu.memory_space<vmem>>, vector<1x4x128xf32>
    %1 = vector.shape_cast %0 : vector<1x4x128xf32> to vector<4x128xf32>
    %c0_2 = arith.constant 0 : index
    %c0_3 = arith.constant 0 : index
    %c0_4 = arith.constant 0 : index
    %2 = vector.load %arg3[%c0_2, %c0_3, %c0_4] : memref<1x4x128xf32, #tpu.memory_space<vmem>>, vector<1x4x128xf32>
    %3 = vector.shape_cast %2 : vector<1x4x128xf32> to vector<4x128xf32>
    %c0_5 = arith.constant 0 : index
    %c0_6 = arith.constant 0 : index
    %4 = vector.load %arg4[%c0_5, %c0_6] : memref<8x4xf32, #tpu.memory_space<vmem>>, vector<8x4xf32>
    %cst = arith.constant dense<0.000000e+00> : vector<8x128xf32>
    %5 = tpu.matmul %4, %1, %cst {dimension_numbers = #tpu.dot_dimension_numbers<[1], [0], [0], [1], [0, 0, 1, 1], [], []>} : vector<8x4xf32>, vector<4x128xf32>, vector<8x128xf32> -> vector<8x128xf32>
    %c0_7 = arith.constant 0 : index
    %c0_8 = arith.constant 0 : index
    %6 = vector.load %arg5[%c0_7, %c0_8] : memref<8x4xf32, #tpu.memory_space<vmem>>, vector<8x4xf32>
    %cst_9 = arith.constant dense<0.000000e+00> : vector<8x128xf32>
    %7 = tpu.matmul %6, %3, %cst_9 {dimension_numbers = #tpu.dot_dimension_numbers<[1], [0], [0], [1], [0, 0, 1, 1], [], []>} : vector<8x4xf32>, vector<4x128xf32>, vector<8x128xf32> -> vector<8x128xf32>
    %8 = arith.addf %5, %7 : vector<8x128xf32>
    %c0_10 = arith.constant 0 : index
    %c0_11 = arith.constant 0 : index
    %9 = vector.load %arg6[%c0_10, %c0_11] : memref<8x1xf32, #tpu.memory_space<vmem>>, vector<8x1xf32>
    %10 = vector.broadcast %9 : vector<8x1xf32> to vector<8x128xf32>
    %11 = arith.addf %8, %10 : vector<8x128xf32>
    %cst_12 = arith.constant 0.000000e+00 : f32
    %12 = vector.broadcast %cst_12 : f32 to vector<8x128xf32>
    %13 = arith.maximumf %11, %12 : vector<8x128xf32>
    %c0_13 = arith.constant 0 : index
    %c0_14 = arith.constant 0 : index
    %14 = vector.load %arg7[%c0_13, %c0_14] : memref<8x1xf32, #tpu.memory_space<vmem>>, vector<8x1xf32>
    %15 = vector.broadcast %14 : vector<8x1xf32> to vector<8x128xf32>
    %16 = arith.mulf %13, %15 : vector<8x128xf32>
    %cst_15 = arith.constant dense<0.000000e+00> : vector<128xf32>
    %17 = vector.multi_reduction <add>, %16, %cst_15 [0] : vector<8x128xf32> to vector<128xf32>
    %18 = vector.shape_cast %17 : vector<128xf32> to vector<1x128xf32>
    %c0_16 = arith.constant 0 : index
    %19 = memref.load %arg8[%c0_16] : memref<1xf32, #tpu.memory_space<smem>>
    %20 = vector.broadcast %19 : f32 to vector<1x128xf32>
    %21 = arith.addf %18, %20 : vector<1x128xf32>
    %22 = arith.negf %21 : vector<1x128xf32>
    %23 = math.exp %22 : vector<1x128xf32>
    %cst_17 = arith.constant 1.000000e+00 : f32
    %24 = vector.broadcast %cst_17 : f32 to vector<1x128xf32>
    %25 = arith.addf %24, %23 : vector<1x128xf32>
    %26 = arith.divf %24, %25 : vector<1x128xf32>
    %27 = vector.broadcast %26 : vector<1x128xf32> to vector<4x128xf32>
    %28 = arith.mulf %3, %27 : vector<4x128xf32>
    %c0_18 = arith.constant 0 : index
    %c0_19 = arith.constant 0 : index
    %c0_20 = arith.constant 0 : index
    %29 = vector.load %arg9[%c0_18, %c0_19, %c0_20] : memref<1x4x128xf32, #tpu.memory_space<vmem>>, vector<1x4x128xf32>
    %30 = vector.shape_cast %29 : vector<1x4x128xf32> to vector<4x128xf32>
    %31 = vector.shape_cast %28 : vector<4x128xf32> to vector<1x4x128xf32>
    tpu.vector_store %arg9[%c0_18, %c0_19, %c0_20], %31 {strides = array<i32>} : memref<1x4x128xf32, #tpu.memory_space<vmem>>, vector<1x4x128xf32>,
    return
  }
  func.func @transform_0(%arg0: i32, %arg1: i32) -> (i32, i32, i32) {
    %c0_i32 = arith.constant 0 : i32
    %c0_i32_0 = arith.constant 0 : i32
    return %arg0, %c0_i32, %arg1 : i32, i32, i32
  }
  func.func @transform_1(%arg0: i32, %arg1: i32) -> (i32, i32, i32) {
    %c0_i32 = arith.constant 0 : i32
    %c0_i32_0 = arith.constant 0 : i32
    return %arg0, %c0_i32, %arg1 : i32, i32, i32
  }
  func.func @transform_2(%arg0: i32, %arg1: i32) -> (i32, i32) {
    %c0_i32 = arith.constant 0 : i32
    %c0_i32_0 = arith.constant 0 : i32
    %c0_i32_1 = arith.constant 0 : i32
    return %c0_i32, %c0_i32_0 : i32, i32
  }
  func.func @transform_3(%arg0: i32, %arg1: i32) -> (i32, i32) {
    %c0_i32 = arith.constant 0 : i32
    %c0_i32_0 = arith.constant 0 : i32
    %c0_i32_1 = arith.constant 0 : i32
    return %c0_i32, %c0_i32_0 : i32, i32
  }
  func.func @transform_4(%arg0: i32, %arg1: i32) -> (i32, i32) {
    %c0_i32 = arith.constant 0 : i32
    %c0_i32_0 = arith.constant 0 : i32
    %c0_i32_1 = arith.constant 0 : i32
    return %c0_i32, %c0_i32_0 : i32, i32
  }
  func.func @transform_5(%arg0: i32, %arg1: i32) -> (i32, i32) {
    %c0_i32 = arith.constant 0 : i32
    %c0_i32_0 = arith.constant 0 : i32
    %c0_i32_1 = arith.constant 0 : i32
    return %c0_i32, %c0_i32_0 : i32, i32
  }
  func.func @transform_6(%arg0: i32, %arg1: i32) -> i32 {
    %c0_i32 = arith.constant 0 : i32
    %c0_i32_0 = arith.constant 0 : i32
    return %c0_i32 : i32
  }
  func.func @transform_7(%arg0: i32, %arg1: i32) -> (i32, i32, i32) {
    %c0_i32 = arith.constant 0 : i32
    %c0_i32_0 = arith.constant 0 : i32
    return %arg0, %c0_i32, %arg1 : i32, i32, i32
  }
}

</mosaic_0001>

<bundles_post_ra>
// kernel: basic_attention.1
= control target key start
LH: loop header
LB: loop body
LE: loop exit
PB: predicated region body
PF: predicated region fallthrough
CT: control target
= control target key end

     0   :  { %s802_s26 = smov 0   ;;  %s804_s27 = smov 0   ;;  %s873_s0 = inlined_call_operand.vmem [shape: f32[2,4,256], index: 0, kind: input, shape index: {}]   ;;  %s874_s1 = inlined_call_operand.vmem [shape: f32[2,4,256], index: 1, kind: input, shape index: {}]   ;;  %s875_s2 = inlined_call_operand.vmem [shape: f32[8,4], index: 2, kind: input, shape index: {}]   ;;  %s876_s3 = inlined_call_operand.vmem [shape: f32[8,4], index: 3, kind: input, shape index: {}]   ;;  %s877_s4 = inlined_call_operand.vmem [shape: f32[8,1], index: 4, kind: input, shape index: {}]   ;;  %s878_s5 = inlined_call_operand.vmem [shape: f32[8,1], index: 5, kind: input, shape index: {}]   ;;  %s879_s6 = inlined_call_operand.<no memory space> [shape: f32[1], index: 6, kind: input, shape index: {}]   ;;  %s880_s7 = inlined_call_operand.vmem [shape: f32[2,4,256], index: 7, kind: output, shape index: {}]  }
   0x1   :  { %12 = sst [smem:[#allocation2]] %s879_s6  ;;  %s806_s28 = smov 0  }
   0x2   :  { %s808_s29 = smov 0   ;;  %s810_s30 = smov 0  }
   0x3 LB: > { %s27_s6 = sadd.s32 1, %s746_s28  ;;  %s30_s8 = sadd.s32 1, %s750_s29  ;;  %s754_s30 = sphi %s810_s30, %s18_s30   ;;  %s750_s29 = sphi %s808_s29, %s884_s29   ;;  %s746_s28 = sphi %s806_s28, %s883_s28   ;;  %s742_s27 = sphi %s804_s27, %s882_s27   ;;  %s738_s26 = sphi %s802_s26, %s881_s26  }
   0x4   : > { %p28_p0 = scmp.ge.s32.totalorder %s27_s6, 2  ;;  %p640_p1 = scmp.ge.s32.totalorder %s754_s30, 1 }
   0x5   : > { %p272_p2 = scmp.lt.s32.totalorder %s754_s30, 5 }
   0x6   : > { %s886_s6 = smov (%p28_p0, %s27_s6), 0  ;;  %s888_s8 = smov (!%p28_p0, %s30_s8), %s750_s29 }
   0x7   : > { %p273_p3 = pnand %p640_p1, %p272_p2  ;;  %p32_p4 = scmp.ge.s32.totalorder %s888_s8, 2 }
   0x8   : > { %p318_p5 = scmp.lt.s32.totalorder (!%p273_p3), %s742_s27, 1  ;;  %p320_p6 = scmp.lt.s32.totalorder (!%p273_p3), %s738_s26, 1  ;;  %v756_v0 = vmov (!%p273_p3), 0.0   ;;  %v500_v1 = vld [vmem:[%s877_s4] sm:$0xff] (!%p273_p3)  ;;  %vm757_vm0 = vmmov (!%p273_p3), 0   ;;  %v758_v2 = vmov (!%p273_p3), 0  }
   0x9   : > { %s890_s8 = smov (%p32_p4, %s888_s8), 0  ;;  %276 = sbr.rel (%p273_p3) target bundleno = 287 (0x11f), region = 48 }
   0xa   : > { %658 = vmatprep.subr.mxu0 (!%p273_p3), %v756_v0  ;;  %663 = vmatprep.subr.mxu1 (!%p273_p3), %v756_v0  ;;  %v508_v3 = vld [vmem:[%s878_s5] sm:$0xff] (!%p273_p3)  ;;  %vm350_vm1 = vcmask (!%p273_p3), 1043456   ;;  %vm346_vm2 = vcmask (!%p273_p3), 31744  }
   0xb   : > { %660 = vmatprep.mubr.msk.f32.mxu0 (!%p273_p3), %vm757_vm0, %v756_v0  ;;  %665 = vmatprep.mubr.msk.f32.mxu1 (!%p273_p3), %vm757_vm0, %v756_v0  ;;  %v345_v4 = vld [vmem:[%s876_s3] sm:$0xff] (!%p273_p3) }
   0xc   : > { %711 = vset.pattern.permute.xlu0 (!%p273_p3), %v758_v2  ;;  %v344_v6 = vld [vmem:[%s875_s2] sm:$0xff] (!%p273_p3) }
   0xd   : > { %503 = vperm.xlu0 (!%p273_p3), %711, %v500_v1  }
  0x10   : > { %s892_s27 = smov (!%p318_p5, %s742_s27), 1  ;;  %s894_s26 = smov (!%p320_p6, %s738_s26), 1 }
  0x11   : > { %s641_s11 = sshll.u32 %s892_s27, 1  ;;  %511 = vperm.xlu0 %711, %v508_v3  }
  0x12   : > { %s323_s12 = sadd.s32 %s641_s11, %s894_s26  ;;  %s521_s26 = sld [smem:[#allocation2]] }
  0x13   : > { %s838_s15 = sshll.u32 %s323_s12, 2 }
  0x14   : > { %s333_s18 = scalar_lea.vmem %s874_s1, %s838_s15  ;;  %s325_s23 = scalar_lea.vmem %s873_s0, %s838_s15 }
  0x15   : > { %v343_v5 = vld [vmem:[%s333_s18] sm:$0xf]  ;;  %s341_s10 = scalar_lea.vmem %s880_s7, %s838_s15 }
  0x16   : > { %659 = vmatpush3.msk.msra.mxu0 %vm350_vm1, %v343_v5  ;;  %v342_v7 = vld [vmem:[%s325_s23] sm:$0xf] }
  0x17   : > { %664 = vmatpush3.msk.msra.mxu1 %vm350_vm1, %v342_v7  ;;  %661 = vmatmul.mubr.msk.f32.vlgmr.msra.gmra.mrb[0].mxu0 %vm346_vm2, %v345_v4 }
  0x18   : > { %666 = vmatmul.mubr.msk.f32.vlgmr.msra.gmra.mrb[0].mxu1 %vm346_vm2, %v344_v6  ;;  %v522_v23 = vstv %s521_s26 }
  0x8c   : > { %v504_v8 = vpop.permute.xlu0 %503 }
  0x90   : > { %v512_v16 = vpop.permute.xlu0 %511 }
  0xea   : > { %v420_v9 = vpop.f32.mrb[0].mxu0 }
  0xeb   : > { %v496_v10 = vpop.f32.mrb[0].mxu1  ;;  %v662_v11 = vpop.f32.mrb[1].mxu0 }
  0xec   : > { %v497_v12 = vadd.f32 %v496_v10, %v420_v9  ;;  %v667_v13 = vpop.f32.mrb[1].mxu1 }
  0xee   : > { %v506_v14 = vadd.f32 %v504_v8, %v497_v12 }
  0xf0   : > { %v507_v15 = vmax.f32 %v506_v14, 0.0 }
  0xf2   : > { %v514_v17 = vmul.f32 %v512_v16, %v507_v15 }
  0xf4   : > { %v515_v18 = vrot.slane %v514_v17, 4 }
  0xf6   : > { %v516_v19 = vadd.f32 %v515_v18, %v514_v17 }
  0xf8   : > { %v517_v20 = vrot.slane %v516_v19, 2 }
  0xfa   : > { %v518_v21 = vadd.f32 %v517_v20, %v516_v19 }
  0xfc   : > { %v519_v22 = vrot.slane %v518_v21, 1 }
  0xfe   : > { %v520_v24 = vadd.f32 %v519_v22, %v518_v21 }
 0x100   : > { %v523_v25 = vadd.f32 %v522_v23, %v520_v24 }
 0x102   : > { %v651_v26 = vmul.f32 -1.442695, %v523_v25 }
 0x104   : > { %712 = vpow2.f32 %v651_v26 }
 0x10e   : > { %v713_v27 = vpop.eup %712 }
 0x10f   : > { %v527_v28 = vadd.f32 1.0, %v713_v27 }
 0x111   : > { %714 = vrcp.f32 %v527_v28 }
 0x11b   : > { %v715_v29 = vpop.eup %714 }
 0x11c   : > { %v530_v30 = vmul.f32 %v715_v29, %v343_v5 }
 0x11e   : > { %531 = vst [vmem:[%s341_s10] sm:$0xf] %v530_v30 }
 0x11f PF: > { %s18_s30 = sadd.s32 1, %s754_s30   ;;  %s881_s26 = smov %s746_s28 }
 0x120   : > { %p15_p7 = scmp.ge.s32.totalorder %s18_s30, 6   ;;  %s882_s27 = smov %s750_s29 }
 0x121   : > { %s883_s28 = smov %s886_s6  ;;  %s884_s29 = smov %s890_s8 }
 0x122   :  { %17 = sbr.rel (!%p15_p7) target bundleno = 3 (0x3), region = 81 }

</bundles_post_ra>
